<compile_context>
chip_gen: v5e
topology: v5e:2x2
jax: 0.10.0
libtpu: 0.0.40
codegen_flags: <defaults>
</compile_context>

<pallas_src>
import functools
import math

import jax
import jax.numpy as jnp
from jax.experimental import pallas as pl
from jax.experimental.pallas import tpu as pltpu


def _round_up(x, m):
    return (x + m - 1) // m * m


def _bert_lm_head_kernel(x_ref, w1_ref, p1_ref, w2_ref, b2_ref, o_ref, h_ref, *, eps):
    """Grid (i over row tiles, j over vocab tiles).

    x_ref : (tile_m, H)   bf16 input rows
    w1_ref: (H, H)        bf16 transform weight, pre-transposed to [in, out]
    p1_ref: (3, H)        f32 packed [dense_bias; ln_gamma; ln_beta]
    w2_ref: (H, tile_v)   bf16 decoder weight, pre-transposed to [in, out] slice
    b2_ref: (1, tile_v)   f32 decoder bias slice
    o_ref : (tile_m, tile_v) output logits
    h_ref : (tile_m, H)   bf16 VMEM scratch holding the transformed activations
    """
    j = pl.program_id(1)

    @pl.when(j == 0)
    def _():
        # dense: x @ W1t  (weights already [in, out] -> plain dot, no transpose),
        # f32 MXU accumulation.
        t = jnp.dot(x_ref[...], w1_ref[...], preferred_element_type=jnp.float32)
        b1 = p1_ref[0:1, :]
        gamma = p1_ref[1:2, :]
        beta = p1_ref[2:3, :]
        t = t + b1
        # exact (erf) gelu, as in the original BERT repo
        t = t * 0.5 * (1.0 + jax.lax.erf(t * (1.0 / math.sqrt(2.0))))
        # LayerNorm over the hidden axis, in f32
        mean = jnp.mean(t, axis=-1, keepdims=True)
        c = t - mean
        var = jnp.mean(c * c, axis=-1, keepdims=True)
        tn = c * jax.lax.rsqrt(var + eps)
        h_ref[...] = (tn * gamma + beta).astype(h_ref.dtype)

    # decoder: h @ W2t + bias  (bf16 operands, f32 MXU accumulation)
    logits = jnp.dot(h_ref[...], w2_ref[...], preferred_element_type=jnp.float32)
    o_ref[...] = (logits + b2_ref[...]).astype(o_ref.dtype)


def bert_lm_prediction_head(hidden_states, dense_w, dense_b, ln_gamma, ln_beta,
                            decoder_w, decoder_b, *, eps=1e-12,
                            tile_m=512, tile_v=1024,
                            matmul_dtype=jnp.bfloat16, out_dtype=None):
    """hidden_states: [B, S, H]; dense_w: [H, H]; decoder_w: [V, H] (PyTorch layouts);
    dense_b/ln_gamma/ln_beta: [H]; decoder_b: [V].  Returns [B, S, V] logits."""
    B, S, H = hidden_states.shape
    V = decoder_w.shape[0]
    M = B * S
    if out_dtype is None:
        out_dtype = hidden_states.dtype

    # --- tile selection -------------------------------------------------------
    # Row tile: multiple of 16 (bf16 sublane packing).  Keep n_m >= 2 whenever the
    # problem is big enough so v7x's two TensorCores (sharded along the 'parallel'
    # row axis) both get work.  Vocab tile: lane-dense multiple of 128.
    m_padded16 = _round_up(M, 16)
    if m_padded16 <= tile_m:
        if M >= 256:
            tile_m = _round_up((M + 1) // 2, 16)   # split into 2 row tiles
        else:
            tile_m = m_padded16
    tile_v = min(tile_v, _round_up(V, 128))

    M_pad = _round_up(M, tile_m)
    V_pad = _round_up(V, tile_v)
    n_m = M_pad // tile_m
    n_v = V_pad // tile_v

    # --- operand preparation (one-time, constant-folded under jit) ------------
    x2d = hidden_states.reshape(M, H).astype(matmul_dtype)
    if M_pad != M:
        x2d = jnp.pad(x2d, ((0, M_pad - M), (0, 0)))

    # Pre-transpose both weights to [in, out] so the kernel's dots are plain
    # row-major contractions (no per-step XLU transpose of the streamed W2 tile).
    w1t = dense_w.T.astype(matmul_dtype)                                 # [H, H]
    p1 = jnp.stack([dense_b, ln_gamma, ln_beta]).astype(jnp.float32)     # [3, H]

    w2t = decoder_w.T.astype(matmul_dtype)                               # [H, V]
    b2 = decoder_b.astype(jnp.float32).reshape(1, V)
    if V_pad != V:
        w2t = jnp.pad(w2t, ((0, 0), (0, V_pad - V)))
        b2 = jnp.pad(b2, ((0, 0), (0, V_pad - V)))

    # Streaming decoder-weight buffering: deeper prefetch only when the vocab axis
    # is long enough to use it.
    w2_buffers = 3 if n_v >= 3 else 2

    # --- VMEM budget (sets an explicit scoped-VMEM limit; v7x safe) -----------
    bf = jnp.dtype(matmul_dtype).itemsize
    ob = jnp.dtype(out_dtype).itemsize

    def _tile_bytes(r, c, itemsize):
        return _round_up(r, 16) * _round_up(c, 128) * itemsize

    vmem_need = (2 * _tile_bytes(tile_m, H, bf)            # x (double-buffered)
                 + 1 * _tile_bytes(H, H, bf)               # w1t (Buffered(1))
                 + 1 * _tile_bytes(3, H, 4)                # packed params (Buffered(1))
                 + w2_buffers * _tile_bytes(H, tile_v, bf) # streaming decoder weight
                 + 2 * _tile_bytes(1, tile_v, 4)           # decoder bias slice
                 + 2 * _tile_bytes(tile_m, tile_v, ob)     # output tile (double-buffered)
                 + _tile_bytes(tile_m, H, bf))             # h scratch
    vmem_limit = int(min(max(vmem_need + (4 << 20), 16 << 20), 64 << 20))

    # --- honest cost estimate (decoder weight is streamed once per row tile) --
    bytes_accessed = (M_pad * H * bf                           # activations in
                      + H * H * bf + 3 * H * 4                 # transform params
                      + n_m * (V_pad * H * bf + V_pad * 4)     # W2 + bias, per row tile
                      + M_pad * V_pad * ob)                    # logits out
    cost = pl.CostEstimate(
        flops=2 * M_pad * H * H + 2 * M_pad * H * V_pad,
        transcendentals=M_pad * H,
        bytes_accessed=int(bytes_accessed))

    kernel = functools.partial(_bert_lm_head_kernel, eps=eps)

    out = pl.pallas_call(
        kernel,
        out_shape=jax.ShapeDtypeStruct((M_pad, V_pad), out_dtype),
        grid_spec=pltpu.PrefetchScalarGridSpec(
            num_scalar_prefetch=0,
            grid=(n_m, n_v),
            in_specs=[
                # input rows (changes per i only)
                pl.BlockSpec((tile_m, H), lambda i, j: (i, 0)),
                # transform weight: resident, single buffer
                pl.BlockSpec((H, H), lambda i, j: (0, 0),
                             pipeline_mode=pl.Buffered(1)),
                # packed bias/gamma/beta: resident, single buffer
                pl.BlockSpec((3, H), lambda i, j: (0, 0),
                             pipeline_mode=pl.Buffered(1)),
                # decoder weight columns: the only truly streaming block
                pl.BlockSpec((H, tile_v), lambda i, j: (0, j),
                             pipeline_mode=pl.Buffered(w2_buffers)),
                # decoder bias slice
                pl.BlockSpec((1, tile_v), lambda i, j: (0, j)),
            ],
            out_specs=pl.BlockSpec((tile_m, tile_v), lambda i, j: (i, j)),
            scratch_shapes=[pltpu.VMEM((tile_m, H), matmul_dtype)],
        ),
        compiler_params=pltpu.CompilerParams(
            dimension_semantics=("parallel", "arbitrary"),
            vmem_limit_bytes=vmem_limit),
        cost_estimate=cost,
    )(x2d, w1t, p1, w2t, b2)

    if M_pad != M or V_pad != V:
        out = out[:M, :V]
    return out.reshape(B, S, V)


def bert_lm_head_ref(hidden_states, dense_w, dense_b, ln_gamma, ln_beta,
                     decoder_w, decoder_b, *, eps=1e-12, matmul_dtype=jnp.float32):
    """Pure-JAX reference. matmul_dtype=bfloat16 mirrors the kernel's operand casts."""
    x = hidden_states.astype(matmul_dtype)
    t = jax.lax.dot_general(x, dense_w.astype(matmul_dtype),
                            dimension_numbers=(((2,), (1,)), ((), ())),
                            preferred_element_type=jnp.float32) + dense_b
    t = t * 0.5 * (1.0 + jax.lax.erf(t * (1.0 / math.sqrt(2.0))))
    mean = jnp.mean(t, axis=-1, keepdims=True)
    var = jnp.mean((t - mean) ** 2, axis=-1, keepdims=True)
    tn = (t - mean) * jax.lax.rsqrt(var + eps) * ln_gamma + ln_beta
    logits = jax.lax.dot_general(tn.astype(matmul_dtype), decoder_w.astype(matmul_dtype),
                                 dimension_numbers=(((2,), (1,)), ((), ())),
                                 preferred_element_type=jnp.float32)
    return logits + decoder_b


if __name__ == "__main__":
    eps = 1e-12
    key = jax.random.PRNGKey(0)

    def make_params(key, H, V):
        k2, k3, k4, k5, k6, k7 = jax.random.split(key, 6)
        dense_w = jax.random.normal(k2, (H, H), dtype=jnp.float32) * 0.02
        dense_b = jax.random.normal(k3, (H,), dtype=jnp.float32) * 0.02
        ln_gamma = 1.0 + 0.1 * jax.random.normal(k4, (H,), dtype=jnp.float32)
        ln_beta = 0.1 * jax.random.normal(k5, (H,), dtype=jnp.float32)
        decoder_w = jax.random.normal(k6, (V, H), dtype=jnp.float32) * 0.02
        decoder_b = jax.random.normal(k7, (V,), dtype=jnp.float32) * 0.02
        return dense_w, dense_b, ln_gamma, ln_beta, decoder_w, decoder_b

    # ---- Case 1: small BERT-ish config (exercises V padding, single row tile) ----
    B, S, H, V = 2, 8, 128, 1000
    kx, kp = jax.random.split(key)
    hidden_states = jax.random.normal(kx, (B, S, H), dtype=jnp.float32)
    params = make_params(kp, H, V)

    out = bert_lm_prediction_head(hidden_states, *params, eps=eps)
    out = jax.block_until_ready(out)
    assert out.shape == (B, S, V)

    ref_bf16 = bert_lm_head_ref(hidden_states, *params, eps=eps,
                                matmul_dtype=jnp.bfloat16)
    assert jnp.allclose(out, ref_bf16, atol=2e-3, rtol=2e-3), "case1: mismatch vs bf16 ref"
    ref_f32 = bert_lm_head_ref(hidden_states, *params, eps=eps,
                               matmul_dtype=jnp.float32)
    assert jnp.allclose(out, ref_f32, atol=5e-2, rtol=5e-2), "case1: mismatch vs f32 ref"

    # ---- Case 2: multi-tile grid (n_m = 2 via megacore split, n_v = 4, Buffered(3)) ----
    B2, S2 = 4, 128        # M = 512 -> split into two 256-row tiles
    kx2, kp2 = jax.random.split(jax.random.PRNGKey(1))
    hs2 = jax.random.normal(kx2, (B2, S2, H), dtype=jnp.float32)
    params2 = make_params(kp2, H, V)

    out2 = bert_lm_prediction_head(hs2, *params2, eps=eps, tile_v=256)
    out2 = jax.block_until_ready(out2)
    assert out2.shape == (B2, S2, V)
    ref2 = bert_lm_head_ref(hs2, *params2, eps=eps, matmul_dtype=jnp.bfloat16)
    assert jnp.allclose(out2, ref2, atol=2e-3, rtol=2e-3), "case2: mismatch vs bf16 ref"

    # ---- Case 3: bf16 logits output (halves output write traffic) ----
    out3 = bert_lm_prediction_head(hidden_states, *params, eps=eps,
                                   out_dtype=jnp.bfloat16)
    out3 = jax.block_until_ready(out3)
    assert out3.dtype == jnp.bfloat16
    assert jnp.allclose(out3.astype(jnp.float32), ref_bf16, atol=8e-3, rtol=2e-2), \
        "case3: mismatch vs bf16 ref"

    print("KERNEL_OK")
</pallas_src>

<mosaic_0001>
module attributes {stable_mosaic.version = 11 : i64} {
  func.func @_bert_lm_head_kernel(%arg0: i32, %arg1: i32, %arg2: memref<16x128xbf16, #tpu.memory_space<vmem>>, %arg3: memref<128x128xbf16, #tpu.memory_space<vmem>>, %arg4: memref<3x128xf32, #tpu.memory_space<vmem>>, %arg5: memref<128x1024xbf16, #tpu.memory_space<vmem>>, %arg6: memref<1x1024xf32, #tpu.memory_space<vmem>>, %arg7: memref<16x1024xf32, #tpu.memory_space<vmem>>, %arg8: memref<16x128xbf16, #tpu.memory_space<vmem>>) attributes {dimension_semantics = [#tpu.dimension_semantics<parallel>, #tpu.dimension_semantics<arbitrary>], iteration_bounds = array<i64: 1, 1>, scalar_prefetch = 0 : i64, scratch_operands = 1 : i64, tpu.core_type = #tpu.core_type<tc>, window_params = [{transform_indices = @transform_0, window_bounds = array<i64: 16, 128>}, {pipeline_mode = #tpu.pipeline_mode<synchronous>, transform_indices = @transform_1, window_bounds = array<i64: 128, 128>}, {pipeline_mode = #tpu.pipeline_mode<synchronous>, transform_indices = @transform_2, window_bounds = array<i64: 3, 128>}, {pipeline_mode = #tpu.pipeline_mode<double_buffered>, transform_indices = @transform_3, window_bounds = array<i64: 128, 1024>}, {transform_indices = @transform_4, window_bounds = array<i64: 1, 1024>}, {transform_indices = @transform_5, window_bounds = array<i64: 16, 1024>}]} {
    %c0_i32 = arith.constant 0 : i32
    %0 = arith.cmpi eq, %arg1, %c0_i32 : i32
    %1 = arith.extui %0 : i1 to i32
    %c0_i32_0 = arith.constant 0 : i32
    %2 = arith.cmpi ne, %1, %c0_i32_0 : i32
    scf.if %2 {
      %c0_8 = arith.constant 0 : index
      %c0_9 = arith.constant 0 : index
      %10 = vector.load %arg2[%c0_8, %c0_9] : memref<16x128xbf16, #tpu.memory_space<vmem>>, vector<16x128xbf16>
      %c0_10 = arith.constant 0 : index
      %c0_11 = arith.constant 0 : index
      %11 = vector.load %arg3[%c0_10, %c0_11] : memref<128x128xbf16, #tpu.memory_space<vmem>>, vector<128x128xbf16>
      %cst_12 = arith.constant dense<0.000000e+00> : vector<16x128xf32>
      %12 = tpu.matmul %10, %11, %cst_12 {dimension_numbers = #tpu.dot_dimension_numbers<[1], [0], [0], [1], [0, 0, 1, 1], [], []>} : vector<16x128xbf16>, vector<128x128xbf16>, vector<16x128xf32> -> vector<16x128xf32>
      %c0_13 = arith.constant 0 : index
      %c0_14 = arith.constant 0 : index
      %13 = vector.load %arg4[%c0_13, %c0_14] : memref<3x128xf32, #tpu.memory_space<vmem>>, vector<1x128xf32>
      %c1 = arith.constant 1 : index
      %c0_15 = arith.constant 0 : index
      %14 = vector.load %arg4[%c1, %c0_15] : memref<3x128xf32, #tpu.memory_space<vmem>>, vector<1x128xf32>
      %c2 = arith.constant 2 : index
      %c0_16 = arith.constant 0 : index
      %15 = vector.load %arg4[%c2, %c0_16] : memref<3x128xf32, #tpu.memory_space<vmem>>, vector<1x128xf32>
      %16 = vector.broadcast %13 : vector<1x128xf32> to vector<16x128xf32>
      %17 = arith.addf %12, %16 : vector<16x128xf32>
      %cst_17 = arith.constant 5.000000e-01 : f32
      %18 = vector.broadcast %cst_17 : f32 to vector<16x128xf32>
      %19 = arith.mulf %17, %18 : vector<16x128xf32>
      %cst_18 = arith.constant 0.707106769 : f32
      %20 = vector.broadcast %cst_18 : f32 to vector<16x128xf32>
      %21 = arith.mulf %17, %20 : vector<16x128xf32>
      %22 = math.erf %21 : vector<16x128xf32>
      %cst_19 = arith.constant 1.000000e+00 : f32
      %23 = vector.broadcast %cst_19 : f32 to vector<16x128xf32>
      %24 = arith.addf %23, %22 : vector<16x128xf32>
      %25 = arith.mulf %19, %24 : vector<16x128xf32>
      %cst_20 = arith.constant dense<0.000000e+00> : vector<16xf32>
      %26 = vector.multi_reduction <add>, %25, %cst_20 [1] : vector<16x128xf32> to vector<16xf32>
      %27 = vector.shape_cast %26 : vector<16xf32> to vector<16x1xf32>
      %cst_21 = arith.constant 1.280000e+02 : f32
      %28 = vector.broadcast %cst_21 : f32 to vector<16x1xf32>
      %29 = arith.divf %27, %28 : vector<16x1xf32>
      %30 = vector.broadcast %29 : vector<16x1xf32> to vector<16x128xf32>
      %31 = arith.subf %25, %30 : vector<16x128xf32>
      %32 = arith.mulf %31, %31 : vector<16x128xf32>
      %cst_22 = arith.constant dense<0.000000e+00> : vector<16xf32>
      %33 = vector.multi_reduction <add>, %32, %cst_22 [1] : vector<16x128xf32> to vector<16xf32>
      %34 = vector.shape_cast %33 : vector<16xf32> to vector<16x1xf32>
      %cst_23 = arith.constant 1.280000e+02 : f32
      %35 = vector.broadcast %cst_23 : f32 to vector<16x1xf32>
      %36 = arith.divf %34, %35 : vector<16x1xf32>
      %cst_24 = arith.constant 9.99999996E-13 : f32
      %37 = vector.broadcast %cst_24 : f32 to vector<16x1xf32>
      %38 = arith.addf %36, %37 : vector<16x1xf32>
      %39 = math.rsqrt %38 : vector<16x1xf32>
      %40 = vector.broadcast %39 : vector<16x1xf32> to vector<16x128xf32>
      %41 = arith.mulf %31, %40 : vector<16x128xf32>
      %42 = vector.broadcast %14 : vector<1x128xf32> to vector<16x128xf32>
      %43 = arith.mulf %41, %42 : vector<16x128xf32>
      %44 = vector.broadcast %15 : vector<1x128xf32> to vector<16x128xf32>
      %45 = arith.addf %43, %44 : vector<16x128xf32>
      %46 = arith.truncf %45 : vector<16x128xf32> to vector<16x128xbf16>
      %c0_25 = arith.constant 0 : index
      %c0_26 = arith.constant 0 : index
      %47 = vector.load %arg8[%c0_25, %c0_26] : memref<16x128xbf16, #tpu.memory_space<vmem>>, vector<16x128xbf16>
      tpu.vector_store %arg8[%c0_25, %c0_26], %46 {strides = array<i32>} : memref<16x128xbf16, #tpu.memory_space<vmem>>, vector<16x128xbf16>,
    } else {
    }
    %c0 = arith.constant 0 : index
    %c0_1 = arith.constant 0 : index
    %3 = vector.load %arg8[%c0, %c0_1] : memref<16x128xbf16, #tpu.memory_space<vmem>>, vector<16x128xbf16>
    %c0_2 = arith.constant 0 : index
    %c0_3 = arith.constant 0 : index
    %4 = vector.load %arg5[%c0_2, %c0_3] : memref<128x1024xbf16, #tpu.memory_space<vmem>>, vector<128x1024xbf16>
    %cst = arith.constant dense<0.000000e+00> : vector<16x1024xf32>
    %5 = tpu.matmul %3, %4, %cst {dimension_numbers = #tpu.dot_dimension_numbers<[1], [0], [0], [1], [0, 0, 1, 1], [], []>} : vector<16x128xbf16>, vector<128x1024xbf16>, vector<16x1024xf32> -> vector<16x1024xf32>
    %c0_4 = arith.constant 0 : index
    %c0_5 = arith.constant 0 : index
    %6 = vector.load %arg6[%c0_4, %c0_5] : memref<1x1024xf32, #tpu.memory_space<vmem>>, vector<1x1024xf32>
    %7 = vector.broadcast %6 : vector<1x1024xf32> to vector<16x1024xf32>
    %8 = arith.addf %5, %7 : vector<16x1024xf32>
    %c0_6 = arith.constant 0 : index
    %c0_7 = arith.constant 0 : index
    %9 = vector.load %arg7[%c0_6, %c0_7] : memref<16x1024xf32, #tpu.memory_space<vmem>>, vector<16x1024xf32>
    tpu.vector_store %arg7[%c0_6, %c0_7], %8 {strides = array<i32>} : memref<16x1024xf32, #tpu.memory_space<vmem>>, vector<16x1024xf32>,
    return
  }
  func.func @transform_0(%arg0: i32, %arg1: i32) -> (i32, i32) {
    %c0_i32 = arith.constant 0 : i32
    %c0_i32_0 = arith.constant 0 : i32
    return %arg0, %c0_i32 : i32, i32
  }
  func.func @transform_1(%arg0: i32, %arg1: i32) -> (i32, i32) {
    %c0_i32 = arith.constant 0 : i32
    %c0_i32_0 = arith.constant 0 : i32
    %c0_i32_1 = arith.constant 0 : i32
    return %c0_i32, %c0_i32_0 : i32, i32
  }
  func.func @transform_2(%arg0: i32, %arg1: i32) -> (i32, i32) {
    %c0_i32 = arith.constant 0 : i32
    %c0_i32_0 = arith.constant 0 : i32
    %c0_i32_1 = arith.constant 0 : i32
    return %c0_i32, %c0_i32_0 : i32, i32
  }
  func.func @transform_3(%arg0: i32, %arg1: i32) -> (i32, i32) {
    %c0_i32 = arith.constant 0 : i32
    %c0_i32_0 = arith.constant 0 : i32
    return %c0_i32, %arg1 : i32, i32
  }
  func.func @transform_4(%arg0: i32, %arg1: i32) -> (i32, i32) {
    %c0_i32 = arith.constant 0 : i32
    %c0_i32_0 = arith.constant 0 : i32
    return %c0_i32, %arg1 : i32, i32
  }
  func.func @transform_5(%arg0: i32, %arg1: i32) -> (i32, i32) {
    %c0_i32 = arith.constant 0 : i32
    return %arg0, %arg1 : i32, i32
  }
}

</mosaic_0001>

<bundles_post_ra>
// kernel: tpu_custom_call.1
= control target key start
LH: loop header
LB: loop body
LE: loop exit
PB: predicated region body
PF: predicated region fallthrough
CT: control target
= control target key end

     0   :  { %10 = vsyncpa [#allocation4], 0  ;;  %s1573_s0 = inlined_call_operand.hbm [shape: bf16[16,128], index: 0, kind: input, shape index: {}]   ;;  %s1574_s1 = inlined_call_operand.hbm [shape: bf16[128,128], index: 1, kind: input, shape index: {}]   ;;  %s1575_s2 = inlined_call_operand.hbm [shape: f32[3,128], index: 2, kind: input, shape index: {}]   ;;  %s1576_s3 = inlined_call_operand.hbm [shape: bf16[128,1024], index: 3, kind: input, shape index: {}]   ;;  %s1577_s4 = inlined_call_operand.hbm [shape: f32[1,1024], index: 4, kind: input, shape index: {}]   ;;  %s1578_s5 = inlined_call_operand.hbm [shape: f32[16,1024], index: 5, kind: output, shape index: {}]  }
   0x1   :  { %11 = vsyncpa [#allocation7], 0 }
   0x2   :  { %12 = vsyncpa [#allocation10], 0 }
   0x3   :  { %13 = vsyncpa [#allocation5], 0  ;;  %s31_s20 = sshll.u32 %s1574_s1, 4  ;;  %s1447_s21 = smov [#allocation6]   ;;  %s32_s20 = int_to_ptr.hbm [resolvable:$true] %s31_s20 }
   0x4   :  { %s33_s22 = sshll.u32 %s1447_s21, 4  ;;  %s55_s25 = sshll.u32 %s1576_s3, 4  ;;  %s34_s22 = int_to_ptr.vmem [resolvable:$true] %s33_s22  ;;  %s56_s25 = int_to_ptr.hbm [resolvable:$true] %s55_s25 }
   0x5   :  { %s1448_s26 = smov 64   ;;  %s1449_s27 = smov 4  }
   0x6   :  { %39 = dma.hbm_to_vmem [thread:$0]  %s32_s20, 1024, %s34_s22, [#allocation7], %s1448_s26, %s1448_s26, %s1449_s27  }
   0x7   :  { %s1450_s28 = smov [#allocation9]   ;;  %s1451_s30 = smov 512  }
   0x8   :  { %s57_s29 = sshll.u32 %s1450_s28, 4  ;;  %s1452_s6 = smov 32   ;;  %s58_s29 = int_to_ptr.vmem [resolvable:$true] %s57_s29 }
   0x9   :  { %63 = dma.hbm_to_vmem [thread:$0]  %s56_s25, 8192, %s58_s29, [#allocation10], %s1451_s30, %s1451_s30, %s1452_s6  }
   0xa   :  { %s18_s8 = sshll.u32 %s1573_s0, 4  ;;  %s1453_s9 = smov [#allocation3]   ;;  %s19_s8 = int_to_ptr.hbm [resolvable:$true] %s18_s8 }
   0xb   :  { %s20_s10 = sshll.u32 %s1453_s9, 4  ;;  %s45_s12 = sshll.u32 %s1575_s2, 4  ;;  %s21_s10 = int_to_ptr.vmem [resolvable:$true] %s20_s10  ;;  %s46_s12 = int_to_ptr.hbm [resolvable:$true] %s45_s12 }
   0xc   :  { %26 = dma.hbm_to_vmem [thread:$0]  %s19_s8, 128, %s21_s10, [#allocation4], %s1448_s26, %s1448_s26, %s1449_s27  }
   0xd   :  { %s1454_s13 = smov [#allocation8]   ;;  %s69_s17 = sshll.u32 %s1577_s4, 4  ;;  %s70_s17 = int_to_ptr.hbm [resolvable:$true] %s69_s17 }
   0xe   :  { %s47_s14 = sshll.u32 %s1454_s13, 4  ;;  %s1455_s0 = smov [#allocation11]   ;;  %s48_s14 = int_to_ptr.vmem [resolvable:$true] %s47_s14 }
   0xf   :  { %50 = dma.hbm_to_vmem [thread:$0]  %s46_s12, 64, %s48_s14, [#allocation7]  }
  0x10   :  { %s71_s18 = sshll.u32 %s1455_s0, 4  ;;  %s72_s18 = int_to_ptr.vmem [resolvable:$true] %s71_s18 }
  0x11   :  { %74 = dma.hbm_to_vmem [thread:$0]  %s70_s17, 128, %s72_s18, [#allocation10]  }
  0x12   :  { %1439 = dma.done.wait [#allocation4], 128  }
  0x13   :  { %1440 = vsyncadd [#allocation4], 4294967168 }
  0x14   :  { %1441 = dma.done.wait [#allocation7], 1088  }
  0x15   :  { %1442 = vsyncadd [#allocation7], 4294966208 }
  0x16   :  { %1443 = dma.done.wait [#allocation10], 8320  }
  0x17   :  { %1444 = vsyncadd [#allocation10], 4294958976  ;;  %v1199_v0 = vld [vmem:[#allocation6 + $0x38] sm:$0xff]  ;;  %v1198_v1 = vld [vmem:[#allocation6 + $0x30] sm:$0xff]  ;;  %s1457_s2 = smov [#allocation12]   ;;  %s878_s21 = sshll.u32 %s1578_s5, 4  ;;  %s879_s21 = int_to_ptr.hbm [resolvable:$true] %s878_s21 }
  0x18   :  { %175 = vmatpush.bf16.msra.mxu0 %v1199_v0  ;;  %v1197_v2 = vld [vmem:[#allocation6 + $0x28] sm:$0xff]  ;;  %v1196_v3 = vld [vmem:[#allocation6 + $0x20] sm:$0xff]  ;;  %v1195_v4 = vld [vmem:[#allocation6 + $0x18] sm:$0xff]  ;;  %s876_s4 = sshll.u32 %s1457_s2, 4  ;;  %s1458_s22 = smov 1024   ;;  %s877_s4 = int_to_ptr.vmem [resolvable:$true] %s876_s4 }
  0x19   :  { %v1194_v5 = vld [vmem:[#allocation6 + $0x10] sm:$0xff]  ;;  %v1193_v6 = vld [vmem:[#allocation6 + $0x8] sm:$0xff]  ;;  %v1192_v7 = vld [vmem:[#allocation6] sm:$0xff] }
  0x1a   :  { %v1191_v8 = vld [vmem:[#allocation3] sm:$0xff]  ;;  %v1282_v9 = vld [vmem:[#allocation8] ss:$0 sm:$0xff] }
  0x1c   :  { %176 = vmatpush.bf16.msra.mxu0 %v1198_v1 }
  0x20   :  { %177 = vmatpush.bf16.msra.mxu0 %v1197_v2 }
  0x24   :  { %178 = vmatpush.bf16.msra.mxu0 %v1196_v3 }
  0x28   :  { %179 = vmatpush.bf16.msra.mxu0 %v1195_v4 }
  0x2c   :  { %180 = vmatpush.bf16.msra.mxu0 %v1194_v5 }
  0x30   :  { %181 = vmatpush.bf16.msra.mxu0 %v1193_v6 }
  0x34   :  { %182 = vmatpush.bf16.msra.mxu0 %v1192_v7 }
  0x37   :  { %183 = vmatmul.bf16.vlgmr.msra.gmra.mxu0 %v1191_v8 }
  0xb4   :  { %v184_v10 = vpop.f32.mrf.mxu0 }
  0xb5   :  { %v1508_v11 = vadd.f32 %v1282_v9, %v184_v10 }
  0xb7   :  { %v191_v12 = vmul.f32 0.70710677, %v1508_v11 }
  0xb9   :  { %v193_v13 = vmul.f32 %v191_v12, %v191_v12 }
  0xbb   :  { %v194_v14 = vmin.f32 %v193_v13, 16.0 }
  0xbc   :  { %v186_v15 = vpop.f32.mrf.mxu0 }
  0xbd   :  { %v195_v16 = vmul.f32 2.1237322e-06, %v194_v14  ;;  %v1511_v17 = vadd.f32 %v1282_v9, %v186_v15  ;;  %v206_v18 = vmul.f32 3.8918573e-05, %v194_v14 }
  0xbf   :  { %v196_v19 = vadd.f32 0.00028619796, %v195_v16  ;;  %v1514_v20 = vmul.f32 0.70710677, %v1511_v17  ;;  %v207_v21 = vadd.f32 0.001143296, %v206_v18 }
  0xc1   :  { %v197_v22 = vmul.f32 %v196_v19, %v194_v14  ;;  %v233_v23 = vmul.f32 %v1514_v20, %v1514_v20  ;;  %v208_v24 = vmul.f32 %v207_v21, %v194_v14  ;;  %v189_v19 = vmul.f32 0.5, %v1508_v11 }
  0xc3   :  { %v234_v25 = vmin.f32 %v233_v23, 16.0  ;;  %v209_v26 = vadd.f32 0.014752088, %v208_v24  ;;  %v198_v27 = vadd.f32 0.0036580483, %v197_v22 }
  0xc5   :  { %v235_v28 = vmul.f32 2.1237322e-06, %v234_v25  ;;  %v246_v29 = vmul.f32 3.8918573e-05, %v234_v25  ;;  %v210_v30 = vmul.f32 %v209_v26, %v194_v14  ;;  %v199_v34 = vmul.f32 %v198_v27, %v194_v14 }
  0xc7   :  { %v236_v31 = vadd.f32 0.00028619796, %v235_v28  ;;  %v247_v32 = vadd.f32 0.001143296, %v246_v29  ;;  %v211_v33 = vadd.f32 0.112945676, %v210_v30 }
  0xc8   :  { %v200_v41 = vadd.f32 0.05243302, %v199_v34  ;;  %v190_v28 = vmul.f32 0.5, %v1511_v17 }
  0xc9   :  { %v237_v35 = vmul.f32 %v236_v31, %v234_v25  ;;  %v248_v36 = vmul.f32 %v247_v32, %v234_v25  ;;  %v212_v37 = vmul.f32 %v211_v33, %v194_v14  ;;  %v1456_v31 = vmov 128.0  }
  0xca   :  { %v201_v47 = vmul.f32 %v200_v41, %v194_v14 }
  0xcb   :  { %v249_v38 = vadd.f32 0.014752088, %v248_v36  ;;  %v238_v39 = vadd.f32 0.0036580483, %v237_v35  ;;  %v213_v40 = vadd.f32 0.4994258, %v212_v37 }
  0xcc   :  { %v202_v51 = vadd.f32 0.18741608, %v201_v47  ;;  %v1163_v47 = vld [vmem:[#allocation9 + $0x1e0] sm:$0xf0] }
  0xcd   :  { %v250_v42 = vmul.f32 %v249_v38, %v234_v25  ;;  %v214_v43 = vmul.f32 %v213_v40, %v194_v14  ;;  %v239_v45 = vmul.f32 %v238_v39, %v234_v25 }
  0xce   :  { %v203_v56 = vmul.f32 %v202_v51, %v194_v14 }
  0xcf   :  { %v251_v44 = vadd.f32 0.112945676, %v250_v42  ;;  %v215_v46 = vadd.f32 1.0, %v214_v43  ;;  %v240_v50 = vadd.f32 0.05243302, %v239_v45 }
  0xd0   :  { %v204_v61 = vadd.f32 1.1283791, %v203_v56  ;;  %v1161_v43 = vld [vmem:[#allocation9 + $0x1c0] sm:$0xf]  ;;  %v1257_v45 = vld [vmem:[#allocation9 + $0x1c4] sm:$0xf] }
  0xd1   :  { %v252_v48 = vmul.f32 %v251_v44, %v234_v25  ;;  %1285 = vrcp.f32 %v215_v46  ;;  %v241_v55 = vmul.f32 %v240_v50, %v234_v25  ;;  %v227_v60 = vand.u32 2147483648, %v215_v46  ;;  %v1261_v44 = vld [vmem:[#allocation9 + $0x1dc] sm:$0xf0] }
  0xd2   :  { %v225_v63 = vand.u32 2147483647, %v215_v46  ;;  %vm221_vm1 = vweird.f32 %v215_v46  ;;  %v205_v5 = vmul.f32 %v204_v61, %v191_v12  ;;  %v1166_v50 = vor.u32 %v1257_v45, %v1163_v47  ;;  %v1253_v56 = vld [vmem:[#allocation9 + $0x19c] sm:$0xf0]  ;;  %v1254_v61 = vld [vmem:[#allocation9 + $0x1a4] sm:$0xf0] }
  0xd3   :  { %v253_v49 = vadd.f32 0.4994258, %v252_v48  ;;  %v242_v59 = vadd.f32 0.18741608, %v241_v55  ;;  %v228_v3 = vor.u32 1.1754944e-38, %v227_v60 }
  0xd4   :  { %vm226_vm3 = vcmp.eq.f32.partialorder %v225_v63, 8.507059e+37  ;;  %v1169_v48 = vld [vmem:[#allocation9 + $0x1c8] sm:$0xf]  ;;  %758 = vmatpush.bf16.msra.mxu2 %v1166_v50  ;;  %v1129_v55 = vld [vmem:[#allocation9 + $0x180] sm:$0xf] }
  0xd5   :  { %v254_v52 = vmul.f32 %v253_v49, %v234_v25  ;;  %v243_v2 = vmul.f32 %v242_v59, %v234_v25  ;;  %v1262_v49 = vld [vmem:[#allocation9 + $0x1e4] sm:$0xf0]  ;;  %v1131_v59 = vld [vmem:[#allocation9 + $0x1a0] sm:$0xf0] }
  0xd6   :  { %v1170_v51 = vor.u32 %v1262_v49, %v1169_v48  ;;  %v1137_v60 = vld [vmem:[#allocation9 + $0x188] sm:$0xf] }
  0xd7   :  { %v255_v53 = vadd.f32 1.0, %v254_v52  ;;  %v1286_v54 = vpop.eup %1285  ;;  %v244_v13 = vadd.f32 1.1283791, %v243_v2  ;;  %v1258_v52 = vld [vmem:[#allocation9 + $0x1cc] sm:$0xf]  ;;  %v1138_v63 = vor.u32 %v1254_v61, %v1137_v60 }
  0xd8   :  { %v217_v57 = vmul.f32 %v1286_v54, %v215_v46  ;;  %vm222_vm0 = vweird.f32 %v1286_v54  ;;  %v1162_v46 = vor.u32 %v1261_v44, %v1161_v43  ;;  %772 = vmatpush.bf16.msra.mxu3 %v1170_v51  ;;  %v1221_v43 = vld [vmem:[#allocation9 + $0x9c] sm:$0xf0]  ;;  %v1217_v44 = vld [vmem:[#allocation9 + $0x84] sm:$0xf]  ;;  %v1009_v47 = vld [vmem:[#allocation9 + $0x88] sm:$0xf] }
  0xd9   :  { %1287 = vrcp.f32 %v255_v53  ;;  %vm223_vm2 = vmor %vm221_vm1, %vm222_vm0  ;;  %v267_v10 = vand.u32 2147483648, %v255_v53  ;;  %v265_v15 = vand.u32 2147483647, %v255_v53  ;;  %vm261_vm5 = vweird.f32 %v255_v53  ;;  %v1222_v48 = vld [vmem:[#allocation9 + $0xa4] sm:$0xf0] }
  0xda   :  { %v218_v58 = vsub.f32 1.0, %v217_v57  ;;  %v245_v12 = vmul.f32 %v244_v13, %v1514_v20  ;;  %1289 = vrcp.f32 %v1456_v31  ;;  %744 = vmatpush.bf16.msra.mxu1 %v1162_v46  ;;  %v1249_v57 = vld [vmem:[#allocation9 + $0x184] sm:$0xf]  ;;  %v1229_v31 = vld [vmem:[#allocation9 + $0xdc] sm:$0xf0]  ;;  %v1010_v50 = vor.u32 %v1222_v48, %v1009_v47 }
  0xdb   :  { %v268_v22 = vor.u32 1.1754944e-38, %v267_v10  ;;  %vm266_vm7 = vcmp.eq.f32.partialorder %v265_v15, 8.507059e+37  ;;  %v1107_v15 = vld [vmem:[#allocation9 + $0x168] sm:$0xf0]  ;;  %v1003_v46 = vld [vmem:[#allocation9 + $0xa0] sm:$0xf0] }
  0xdc   :  { %v219_v62 = vmul.f32 %v1286_v54, %v218_v58  ;;  %v1130_v58 = vor.u32 %v1253_v56, %v1129_v55  ;;  %773 = vmatpush.bf16.msra.mxu3 %v1138_v63  ;;  %v1006_v49 = vor.u32 %v1217_v44, %v1003_v46  ;;  %v1218_v51 = vld [vmem:[#allocation9 + $0x8c] sm:$0xf]  ;;  %v1213_v55 = vld [vmem:[#allocation9 + $0x5c] sm:$0xf0]  ;;  %v1209_v56 = vld [vmem:[#allocation9 + $0x44] sm:$0xf] }
  0xdd   :  { %v1214_v60 = vld [vmem:[#allocation9 + $0x64] sm:$0xf0]  ;;  %v1210_v63 = vld [vmem:[#allocation9 + $0x4c] sm:$0xf]  ;;  %v1113_v44 = vld [vmem:[#allocation9 + $0x150] sm:$0xf] }
  0xde   :  { %v220_v1 = vadd.f32 %v1286_v54, %v219_v62  ;;  %v1134_v62 = vor.u32 %v1249_v57, %v1131_v59  ;;  %745 = vmatpush.bf16.msra.mxu1 %v1130_v58  ;;  %v971_v58 = vld [vmem:[#allocation9 + $0x60] sm:$0xf0]  ;;  %v977_v59 = vld [vmem:[#allocation9 + $0x48] sm:$0xf]  ;;  %v1243_v46 = vld [vmem:[#allocation9 + $0x154] sm:$0xf] }
  0xdf   :  { %v1288_v0 = vpop.eup %1287  ;;  %v974_v61 = vor.u32 %v1209_v56, %v971_v58  ;;  %v1115_v48 = vld [vmem:[#allocation9 + $0x170] sm:$0xf0]  ;;  %v1081_v56 = vld [vmem:[#allocation9 + $0x110] sm:$0xf] }
  0xe0   :  { %v257_v4 = vmul.f32 %v1288_v0, %v255_v53  ;;  %v224_v6 = vsel %vm223_vm2, %v1286_v54, %v220_v1  ;;  %vm262_vm4 = vweird.f32 %v1288_v0  ;;  %v1290_v11 = vpop.eup %1289  ;;  %v1171_v53 = vld [vmem:[#allocation9 + $0x1e8] sm:$0xf0]  ;;  %759 = vmatpush.bf16.msra.mxu2 %v1134_v62  ;;  %v978_v62 = vor.u32 %v1214_v60, %v977_v59  ;;  %v1239_v59 = vld [vmem:[#allocation9 + $0x12c] sm:$0xf0]  ;;  %v1235_v60 = vld [vmem:[#allocation9 + $0x114] sm:$0xf] }
  0xe1   :  { %v229_v7 = vsel %vm226_vm3, %v228_v3, %v224_v6  ;;  %vm263_vm6 = vmor %vm261_vm5, %vm262_vm4  ;;  %v282_v32 = vmul.f32 128.0, %v1290_v11  ;;  %vm286_vm8 = vweird.f32 %v1290_v11  ;;  %v1174_v54 = vor.u32 %v1258_v52, %v1171_v53  ;;  %v1139_v1 = vld [vmem:[#allocation9 + $0x1a8] sm:$0xf0]  ;;  %v1097_v3 = vld [vmem:[#allocation9 + $0x140] sm:$0xf] }
  0xe2   :  { %v258_v8 = vsub.f32 1.0, %v257_v4  ;;  %v230_v9 = vmul.f32 %v229_v7, %v205_v5  ;;  %v1245_v4 = vld [vmem:[#allocation9 + $0x15c] sm:$0xf0]  ;;  %v1241_v5 = vld [vmem:[#allocation9 + $0x144] sm:$0xf] }
  0xe3   :  { %v283_v33 = vsub.f32 1.0, %v282_v32  ;;  %786 = vmatpush.bf16.msrb.mxu0 %v1174_v54  ;;  %v1098_v6 = vor.u32 %v1245_v4, %v1097_v3  ;;  %v1099_v7 = vld [vmem:[#allocation9 + $0x160] sm:$0xf0]  ;;  %v1011_v52 = vld [vmem:[#allocation9 + $0xa8] sm:$0xf0] }
  0xe4   :  { %v259_v14 = vmul.f32 %v1288_v0, %v258_v8  ;;  %v929_v16 = vclamps-f32 %v230_v9, 1.0  ;;  %v1105_v8 = vld [vmem:[#allocation9 + $0x148] sm:$0xf]  ;;  %v1102_v10 = vor.u32 %v1241_v5, %v1099_v7  ;;  %v1014_v53 = vor.u32 %v1218_v51, %v1011_v52  ;;  %v969_v54 = vld [vmem:[#allocation9 + $0x40] sm:$0xf] }
  0xe5   :  { %v284_v34 = vmul.f32 %v1290_v11, %v283_v33  ;;  %v1246_v9 = vld [vmem:[#allocation9 + $0x164] sm:$0xf0]  ;;  %746 = vmatpush.bf16.msra.mxu1 %v1098_v6  ;;  %v1035_v33 = vld [vmem:[#allocation9 + $0xe0] sm:$0xf0]  ;;  %v970_v57 = vor.u32 %v1213_v55, %v969_v54  ;;  %v1205_v3 = vld [vmem:[#allocation9 + $0x1c] sm:$0xf0]  ;;  %v1118_v52 = vor.u32 %v1243_v46, %v1115_v48 }
  0xe6   :  { %v260_v18 = vadd.f32 %v1288_v0, %v259_v14  ;;  %v273_v21 = vadd.f32 1.0, %v929_v16  ;;  %v1106_v13 = vor.u32 %v1246_v9, %v1105_v8  ;;  %v1242_v14 = vld [vmem:[#allocation9 + $0x14c] sm:$0xf]  ;;  %760 = vmatpush.bf16.msra.mxu2 %v1102_v10  ;;  %v1201_v4 = vld [vmem:[#allocation9 + $0x4] sm:$0xf] }
  0xe7   :  { %v285_v35 = vadd.f32 %v1290_v11, %v284_v34  ;;  %v1110_v16 = vor.u32 %v1242_v14, %v1107_v15  ;;  %v1041_v34 = vld [vmem:[#allocation9 + $0xc8] sm:$0xf]  ;;  %v939_v6 = vld [vmem:[#allocation9 + $0x20] sm:$0xf0]  ;;  %v947_v14 = vld [vmem:[#allocation9 + $0x28] sm:$0xf0] }
  0xe8   :  { %v264_v23 = vsel %vm263_vm6, %v1288_v0, %v260_v18  ;;  %v275_v24 = vmul.f32 %v273_v21, %v189_v19  ;;  %v1250_v0 = vld [vmem:[#allocation9 + $0x18c] sm:$0xf]  ;;  %774 = vmatpush.bf16.msra.mxu3 %v1106_v13  ;;  %v1065_v18 = vld [vmem:[#allocation9 + $0x100] sm:$0xf]  ;;  %v1233_v21 = vld [vmem:[#allocation9 + $0x104] sm:$0xf]  ;;  %v942_v9 = vor.u32 %v1201_v4, %v939_v6 }
  0xe9   :  { %v269_v25 = vsel %vm266_vm7, %v268_v22, %v264_v23  ;;  %v1521_v20 = vsel %vm286_vm8, %v1290_v11, %v285_v35  ;;  %v1142_v2 = vor.u32 %v1250_v0, %v1139_v1  ;;  %v1237_v19 = vld [vmem:[#allocation9 + $0x11c] sm:$0xf0]  ;;  %v1073_v23 = vld [vmem:[#allocation9 + $0x108] sm:$0xf]  ;;  %v1225_v11 = vld [vmem:[#allocation9 + $0xc4] sm:$0xf] }
  0xea   :  { %v270_v26 = vmul.f32 %v269_v25, %v245_v12  ;;  %277 = vadd.xlane.f32.xlu0 %v275_v24  ;;  %v1066_v22 = vor.u32 %v1237_v19, %v1065_v18  ;;  %v1067_v12 = vld [vmem:[#allocation9 + $0x120] sm:$0xf0]  ;;  %v1230_v35 = vld [vmem:[#allocation9 + $0xe4] sm:$0xf0]  ;;  %v979_v0 = vld [vmem:[#allocation9 + $0x68] sm:$0xf0] }
  0xeb   :  { %787 = vmatpush.bf16.msrb.mxu0 %v1142_v2  ;;  %v1070_v25 = vor.u32 %v1233_v21, %v1067_v12  ;;  %v982_v1 = vor.u32 %v1210_v63, %v979_v0  ;;  %v937_v2 = vld [vmem:[#allocation9] sm:$0xf]  ;;  %v945_v7 = vld [vmem:[#allocation9 + $0x8] sm:$0xf]  ;;  %v1202_v13 = vld [vmem:[#allocation9 + $0xc] sm:$0xf] }
  0xec   :  { %v930_v27 = vclamps-f32 %v270_v26, 1.0  ;;  %747 = vmatpush.bf16.msra.mxu1 %v1066_v22  ;;  %v938_v5 = vor.u32 %v1205_v3, %v937_v2  ;;  %v1206_v8 = vld [vmem:[#allocation9 + $0x24] sm:$0xf0]  ;;  %v1177_v15 = vld [vmem:[#allocation9 + $0x1d0] sm:$0xf]  ;;  %v950_v18 = vor.u32 %v1202_v13, %v947_v14  ;;  %v1082_v3 = vor.u32 %v1239_v59, %v1081_v56 }
  0xed   :  { %761 = vmatpush.bf16.msra.mxu2 %v1070_v25  ;;  %v946_v10 = vor.u32 %v1206_v8, %v945_v7  ;;  %v1263_v19 = vld [vmem:[#allocation9 + $0x1ec] sm:$0xf0]  ;;  %v1259_v21 = vld [vmem:[#allocation9 + $0x1d4] sm:$0xf]  ;;  %v1185_v25 = vld [vmem:[#allocation9 + $0x1d8] sm:$0xf] }
  0xee   :  { %v274_v29 = vadd.f32 1.0, %v930_v27  ;;  %v1234_v27 = vld [vmem:[#allocation9 + $0x10c] sm:$0xf]  ;;  %v1179_v22 = vld [vmem:[#allocation9 + $0x1f0] sm:$0xf0] }
  0xef   :  { %788 = vmatpush.bf16.msrb.mxu0 %v1110_v16  ;;  %v1244_v54 = vld [vmem:[#allocation9 + $0x15c] sm:$0xf]  ;;  %v1240_v63 = vld [vmem:[#allocation9 + $0x134] sm:$0xf0]  ;;  %v1227_v13 = vld [vmem:[#allocation9 + $0xd4] sm:$0xf] }
  0xf0   :  { %v276_v30 = vmul.f32 %v274_v29, %v190_v28  ;;  %v1075_v28 = vld [vmem:[#allocation9 + $0x128] sm:$0xf0]  ;;  %v1123_v55 = vld [vmem:[#allocation9 + $0x178] sm:$0xf0]  ;;  %v987_v46 = vld [vmem:[#allocation9 + $0x70] sm:$0xf0] }
  0xf1   :  { %v1078_v29 = vor.u32 %v1234_v27, %v1075_v28  ;;  %v1260_v27 = vld [vmem:[#allocation9 + $0x1dc] sm:$0xf]  ;;  %v1126_v58 = vor.u32 %v1244_v54, %v1123_v55  ;;  %v953_v56 = vld [vmem:[#allocation9 + $0x10] sm:$0xf]  ;;  %v1203_v59 = vld [vmem:[#allocation9 + $0x14] sm:$0xf] }
  0xf2   :  { %279 = vadd.xlane.f32.xlu0 %v276_v30  ;;  %v1236_v0 = vld [vmem:[#allocation9 + $0x11c] sm:$0xf] }
  0xf3   :  { %789 = vmatpush.bf16.msrb.mxu0 %v1078_v29  ;;  %v1187_v29 = vld [vmem:[#allocation9 + $0x1f8] sm:$0xf0] }
 0x15d   :  { %v278_v36 = vpop.xlane.xlu0 %277 }
 0x15e   :  { %v288_v37 = vmul.f32 %v1521_v20, %v278_v36  ;;  %v1038_v36 = vor.u32 %v1225_v11, %v1035_v33 }
 0x160   :  { %v1524_v38 = vsub.f32 %v275_v24, %v288_v37  ;;  %v1238_v24 = vld [vmem:[#allocation9 + $0x124] sm:$0xf0]  ;;  %v1042_v37 = vor.u32 %v1230_v35, %v1041_v34  ;;  %762 = vmatpush.bf16.msra.mxu2 %v1038_v36  ;;  %v1251_v34 = vld [vmem:[#allocation9 + $0x194] sm:$0xf] }
 0x161   :  { %v1074_v26 = vor.u32 %v1238_v24, %v1073_v23  ;;  %v1178_v23 = vor.u32 %v1263_v19, %v1177_v15  ;;  %v1182_v24 = vor.u32 %v1259_v21, %v1179_v22  ;;  %v1147_v35 = vld [vmem:[#allocation9 + $0x1b0] sm:$0xf0]  ;;  %v1232_v21 = vld [vmem:[#allocation9 + $0xf4] sm:$0xf0]  ;;  %v1228_v22 = vld [vmem:[#allocation9 + $0xdc] sm:$0xf] }
 0x162   :  { %v292_v17 = vmul.f32 %v1524_v38, %v1524_v38  ;;  %v1150_v36 = vor.u32 %v1251_v34, %v1147_v35 }
 0x163   :  { %775 = vmatpush.bf16.msra.mxu3 %v1074_v26  ;;  %v1264_v26 = vld [vmem:[#allocation9 + $0x1f4] sm:$0xf0] }
 0x164   :  { %294 = vadd.xlane.f32.xlu1 %v292_v17  ;;  %v1226_v17 = vld [vmem:[#allocation9 + $0xcc] sm:$0xf]  ;;  %763 = vmatpush.bf16.msra.mxu2 %v1006_v49  ;;  %v1186_v28 = vor.u32 %v1264_v26, %v1185_v25  ;;  %v1121_v49 = vld [vmem:[#allocation9 + $0x158] sm:$0xf]  ;;  %v1017_v26 = vld [vmem:[#allocation9 + $0x90] sm:$0xf] }
 0x165   :  { %v280_v39 = vpop.xlane.xlu0 %279 }
 0x166   :  { %v289_v40 = vmul.f32 %v1521_v20, %v280_v39  ;;  %v1043_v39 = vld [vmem:[#allocation9 + $0xe8] sm:$0xf0] }
 0x167   :  { %776 = vmatpush.bf16.msra.mxu3 %v1042_v37  ;;  %v1153_v37 = vld [vmem:[#allocation9 + $0x198] sm:$0xf] }
 0x168   :  { %v1529_v41 = vsub.f32 %v276_v30, %v289_v40  ;;  %v1033_v30 = vld [vmem:[#allocation9 + $0xc0] sm:$0xf]  ;;  %v1046_v40 = vor.u32 %v1226_v17, %v1043_v39  ;;  %764 = vmatpush.bf16.msra.mxu2 %v974_v61  ;;  %v1256_v17 = vld [vmem:[#allocation9 + $0x1b4] sm:$0xf0]  ;;  %v1252_v39 = vld [vmem:[#allocation9 + $0x19c] sm:$0xf] }
 0x169   :  { %v1034_v32 = vor.u32 %v1229_v31, %v1033_v30  ;;  %v1145_v30 = vld [vmem:[#allocation9 + $0x190] sm:$0xf]  ;;  %v1083_v61 = vld [vmem:[#allocation9 + $0x130] sm:$0xf0] }
 0x16a   :  { %v293_v42 = vmul.f32 %v1529_v41, %v1529_v41  ;;  %790 = vmatpush.bf16.msrb.mxu0 %v1046_v40  ;;  %v1255_v31 = vld [vmem:[#allocation9 + $0x1ac] sm:$0xf0]  ;;  %v1154_v40 = vor.u32 %v1256_v17, %v1153_v37  ;;  %v1086_v4 = vor.u32 %v1235_v60, %v1083_v61  ;;  %v1220_v37 = vld [vmem:[#allocation9 + $0x9c] sm:$0xf]  ;;  %v955_v60 = vld [vmem:[#allocation9 + $0x30] sm:$0xf0] }
 0x16b   :  { %748 = vmatpush.bf16.msra.mxu1 %v1034_v32  ;;  %777 = vmatpush.bf16.msra.mxu3 %v1010_v50  ;;  %v1190_v32 = vor.u32 %v1260_v27, %v1187_v29  ;;  %v1146_v33 = vor.u32 %v1255_v31, %v1145_v30  ;;  %v1248_v50 = vld [vmem:[#allocation9 + $0x174] sm:$0xf0]  ;;  %v1223_v27 = vld [vmem:[#allocation9 + $0xac] sm:$0xf0]  ;;  %v1219_v30 = vld [vmem:[#allocation9 + $0x94] sm:$0xf] }
 0x16c   :  { %296 = vadd.xlane.f32.xlu1 %v293_v42  ;;  %v1001_v42 = vld [vmem:[#allocation9 + $0x80] sm:$0xf]  ;;  %765 = vmatpush.bf16.msra.mxu2 %v942_v9  ;;  %v1049_v9 = vld [vmem:[#allocation9 + $0xd0] sm:$0xf]  ;;  %v1018_v29 = vor.u32 %v1223_v27, %v1017_v26  ;;  %v1019_v31 = vld [vmem:[#allocation9 + $0xb0] sm:$0xf0] }
 0x16d   :  { %v1002_v45 = vor.u32 %v1221_v43, %v1001_v42  ;;  %v1155_v42 = vld [vmem:[#allocation9 + $0x1b8] sm:$0xf0]  ;;  %v1022_v35 = vor.u32 %v1219_v30, %v1019_v31  ;;  %v961_v61 = vld [vmem:[#allocation9 + $0x18] sm:$0xf] }
 0x16e   :  { %791 = vmatpush.bf16.msrb.mxu0 %v1014_v53  ;;  %v1158_v43 = vor.u32 %v1252_v39, %v1155_v42  ;;  %v1122_v53 = vor.u32 %v1248_v50, %v1121_v49  ;;  %v1027_v17 = vld [vmem:[#allocation9 + $0xb8] sm:$0xf0]  ;;  %v1216_v50 = vld [vmem:[#allocation9 + $0x74] sm:$0xf0] }
 0x16f   :  { %749 = vmatpush.bf16.msra.mxu1 %v1002_v45  ;;  %778 = vmatpush.bf16.msra.mxu3 %v978_v62  ;;  %v1247_v45 = vld [vmem:[#allocation9 + $0x16c] sm:$0xf0]  ;;  %v1089_v62 = vld [vmem:[#allocation9 + $0x118] sm:$0xf]  ;;  %v1030_v42 = vor.u32 %v1220_v37, %v1027_v17 }
 0x170   :  { %814 = vmatpush.bf16.msrb.mxu2 %v1182_v24  ;;  %v1114_v47 = vor.u32 %v1247_v45, %v1113_v44  ;;  %v1090_v6 = vor.u32 %v1240_v63, %v1089_v62  ;;  %v1215_v44 = vld [vmem:[#allocation9 + $0x6c] sm:$0xf0]  ;;  %v1211_v45 = vld [vmem:[#allocation9 + $0x54] sm:$0xf]  ;;  %v1208_v63 = vld [vmem:[#allocation9 + $0x34] sm:$0xf0] }
 0x171   :  { %v990_v49 = vor.u32 %v1211_v45, %v987_v46 }
 0x172   :  { %792 = vmatpush.bf16.msrb.mxu0 %v982_v1 }
 0x173   :  { %750 = vmatpush.bf16.msra.mxu1 %v970_v57  ;;  %779 = vmatpush.bf16.msra.mxu3 %v946_v10  ;;  %v1231_v10 = vld [vmem:[#allocation9 + $0xec] sm:$0xf0] }
 0x174   :  { %815 = vmatpush.bf16.msrb.mxu2 %v1150_v36  ;;  %v1050_v15 = vor.u32 %v1231_v10, %v1049_v9  ;;  %v1224_v36 = vld [vmem:[#allocation9 + $0xb4] sm:$0xf0]  ;;  %v1284_v10 = vld [vmem:[#allocation8 + $0x2] ss:$0 sm:$0xff] }
 0x176   :  { %793 = vmatpush.bf16.msrb.mxu0 %v950_v18  ;;  %v1057_v18 = vld [vmem:[#allocation9 + $0xd8] sm:$0xf] }
 0x177   :  { %751 = vmatpush.bf16.msra.mxu1 %v938_v5  ;;  %828 = vmatpush.bf16.msrb.mxu3 %v1186_v28  ;;  %v1091_v5 = vld [vmem:[#allocation9 + $0x138] sm:$0xf0]  ;;  %v1058_v24 = vor.u32 %v1232_v21, %v1057_v18 }
 0x178   :  { %816 = vmatpush.bf16.msrb.mxu2 %v1118_v52  ;;  %v1094_v7 = vor.u32 %v1236_v0, %v1091_v5  ;;  %v995_v52 = vld [vmem:[#allocation9 + $0x78] sm:$0xf0]  ;;  %v958_v5 = vor.u32 %v1203_v59, %v955_v60 }
 0x179   :  { %v1204_v0 = vld [vmem:[#allocation9 + $0x1c] sm:$0xf] }
 0x17a   :  { %842 = vmatpush.bf16.msra.mxu0 %v1190_v32  ;;  %v1025_v32 = vld [vmem:[#allocation9 + $0x98] sm:$0xf] }
 0x17b   :  { %800 = vmatpush.bf16.msrb.mxu1 %v1178_v23  ;;  %829 = vmatpush.bf16.msrb.mxu3 %v1154_v40  ;;  %v1026_v40 = vor.u32 %v1224_v36, %v1025_v32 }
 0x17c   :  { %817 = vmatpush.bf16.msrb.mxu2 %v1086_v4 }
 0x17e   :  { %843 = vmatpush.bf16.msra.mxu0 %v1158_v43  ;;  %v985_v43 = vld [vmem:[#allocation9 + $0x50] sm:$0xf] }
 0x17f   :  { %801 = vmatpush.bf16.msrb.mxu1 %v1146_v33  ;;  %830 = vmatpush.bf16.msrb.mxu3 %v1122_v53  ;;  %v986_v48 = vor.u32 %v1215_v44, %v985_v43 }
 0x182   :  { %844 = vmatpush.bf16.msra.mxu0 %v1126_v58 }
 0x183   :  { %802 = vmatpush.bf16.msrb.mxu1 %v1114_v47  ;;  %831 = vmatpush.bf16.msrb.mxu3 %v1090_v6  ;;  %v993_v47 = vld [vmem:[#allocation9 + $0x58] sm:$0xf] }
 0x184   :  { %v994_v55 = vor.u32 %v1216_v50, %v993_v47 }
 0x186   :  { %845 = vmatpush.bf16.msra.mxu0 %v1094_v7  ;;  %v962_v7 = vor.u32 %v1208_v63, %v961_v61 }
 0x187   :  { %803 = vmatpush.bf16.msrb.mxu1 %v1082_v3  ;;  %832 = vmatpush.bf16.msrb.mxu3 %v1058_v24  ;;  %v1283_v3 = vld [vmem:[#allocation8 + $0x1] ss:$0 sm:$0xff] }
 0x18b   :  { %804 = vmatpush.bf16.msrb.mxu1 %v1050_v15  ;;  %833 = vmatpush.bf16.msrb.mxu3 %v1026_v40 }
 0x18f   :  { %805 = vmatpush.bf16.msrb.mxu1 %v1018_v29  ;;  %834 = vmatpush.bf16.msrb.mxu3 %v994_v55 }
 0x193   :  { %806 = vmatpush.bf16.msrb.mxu1 %v986_v48  ;;  %835 = vmatpush.bf16.msrb.mxu3 %v962_v7 }
 0x1d7   :  { %v295_v16 = vpop.xlane.xlu1 %294 }
 0x1d8   :  { %v298_v12 = vmul.f32 %v295_v16, %v1521_v20  ;;  %v1051_v16 = vld [vmem:[#allocation9 + $0xf0] sm:$0xf0] }
 0x1d9   :  { %v1054_v19 = vor.u32 %v1227_v13, %v1051_v16 }
 0x1da   :  { %v1534_v11 = vadd.f32 1e-12, %v298_v12  ;;  %v1059_v12 = vld [vmem:[#allocation9 + $0xf8] sm:$0xf0] }
 0x1db   :  { %v1062_v25 = vor.u32 %v1228_v22, %v1059_v12  ;;  %818 = vmatpush.bf16.msrb.mxu2 %v1054_v19  ;;  %v400_v19 = vld [vmem:[#allocation11] sm:$0xff] }
 0x1dc   :  { %1291 = vrsqrt.f32 %v1534_v11  ;;  %vm308_vm10 = vweird.f32 %v1534_v11  ;;  %v405_v21 = vperm.slane %v400_v19, 3  ;;  %v404_v26 = vperm.slane %v400_v19, 2 }
 0x1dd   :  { %846 = vmatpush.bf16.msra.mxu0 %v1062_v25  ;;  %v403_v25 = vperm.slane %v400_v19, 1  ;;  %v409_v37 = vperm.slane %v400_v19, 7  ;;  %v407_v45 = vperm.slane %v400_v19, 5  ;;  %v408_v46 = vperm.slane %v400_v19, 6 }
 0x1df   :  { %v297_v51 = vpop.xlane.xlu1 %296  ;;  %819 = vmatpush.bf16.msrb.mxu2 %v1022_v35  ;;  %v406_v35 = vperm.slane %v400_v19, 4 }
 0x1e0   :  { %v299_v57 = vmul.f32 %v297_v51, %v1521_v20  ;;  %v1212_v51 = vld [vmem:[#allocation9 + $0x5c] sm:$0xf] }
 0x1e1   :  { %847 = vmatpush.bf16.msra.mxu0 %v1030_v42  ;;  %v998_v58 = vor.u32 %v1212_v51, %v995_v52 }
 0x1e2   :  { %v1538_v1 = vpop.eup %1291  ;;  %v1540_v2 = vadd.f32 1e-12, %v299_v57  ;;  %v1207_v57 = vld [vmem:[#allocation9 + $0x2c] sm:$0xf0] }
 0x1e3   :  { %v303_v20 = vmul.f32 %v1538_v1, %v1534_v11  ;;  %vm309_vm9 = vweird.f32 %v1538_v1  ;;  %820 = vmatpush.bf16.msrb.mxu2 %v990_v49 }
 0x1e4   :  { %1293 = vrsqrt.f32 %v1540_v2  ;;  %vm1555_vm11 = vmor %vm308_vm10, %vm309_vm9  ;;  %vm318_vm13 = vweird.f32 %v1540_v2 }
 0x1e5   :  { %v304_v8 = vmul.f32 %v1538_v1, %v303_v20  ;;  %v963_v20 = vld [vmem:[#allocation9 + $0x38] sm:$0xf0]  ;;  %848 = vmatpush.bf16.msra.mxu0 %v998_v58 }
 0x1e7   :  { %v305_v14 = vmul.f32 0.5, %v304_v8  ;;  %v966_v8 = vor.u32 %v1204_v0, %v963_v20  ;;  %821 = vmatpush.bf16.msrb.mxu2 %v958_v5 }
 0x1e9   :  { %v306_v23 = vsub.f32 1.5, %v305_v14  ;;  %849 = vmatpush.bf16.msra.mxu0 %v966_v8 }
 0x1ea   :  { %v1547_v28 = vpop.eup %1293 }
 0x1eb   :  { %v307_v33 = vmul.f32 %v1538_v1, %v306_v23  ;;  %v313_v34 = vmul.f32 %v1547_v28, %v1540_v2  ;;  %vm319_vm12 = vweird.f32 %v1547_v28 }
 0x1ec   :  { %vm320_vm14 = vmor %vm318_vm13, %vm319_vm12 }
 0x1ed   :  { %v314_v11 = vmul.f32 %v1547_v28, %v313_v34  ;;  %v311_v53 = vsel %vm1555_vm11, %v1538_v1, %v307_v33  ;;  %v954_v1 = vor.u32 %v1207_v57, %v953_v56 }
 0x1ee   :  { %v322_v4 = vmul.f32 %v311_v53, %v1524_v38 }
 0x1ef   :  { %v315_v54 = vmul.f32 0.5, %v314_v11  ;;  %807 = vmatpush.bf16.msrb.mxu1 %v954_v1 }
 0x1f0   :  { %v325_v13 = vmul.f32 %v1283_v3, %v322_v4 }
 0x1f1   :  { %v316_v62 = vsub.f32 1.5, %v315_v54 }
 0x1f2   :  { %v328_v15 = vadd.f32 %v1284_v10, %v325_v13 }
 0x1f3   :  { %v317_v6 = vmul.f32 %v1547_v28, %v316_v62 }
 0x1f5   :  { %v321_v9 = vsel %vm320_vm14, %v1547_v28, %v317_v6 }
 0x1f6   :  { %v323_v38 = vmul.f32 %v321_v9, %v1529_v41  ;;  %v402_v41 = vperm.slane %v400_v19, 0 }
 0x1f8   :  { %v326_v14 = vmul.f32 %v1283_v3, %v323_v38 }
 0x1fa   :  { %v329_v16 = vadd.f32 %v1284_v10, %v326_v14 }
 0x1fc   :  { %v1268_v18 = vpack.c.bf16 %v329_v16, %v328_v15 }
 0x1fe   :  { %1269 = vst [vmem:[#allocation2] sm:$0xff] %v1268_v18  }
 0x205   :  { %v1200_v2 = vld [vmem:[#allocation2] sm:$0xff] }
 0x206   :  { %752 = vmatmul.bf16.vlgmr.msra.gmra.mxu1 %v1200_v2  ;;  %766 = vmatmul.bf16.vlgmr.msra.gmra.mxu2 %v1200_v2 }
 0x207   :  { %780 = vmatmul.bf16.vlgmr.msra.gmra.mxu3 %v1200_v2  ;;  %794 = vmatmul.bf16.vlgmr.msrb.gmra.mxu0 %v1200_v2 }
 0x216   :  { %808 = vmatmul.bf16.vlgmr.msrb.gmra.mxu1 %v1200_v2  ;;  %822 = vmatmul.bf16.vlgmr.msrb.gmra.mxu2 %v1200_v2 }
 0x217   :  { %836 = vmatmul.bf16.vlgmr.msrb.gmra.mxu3 %v1200_v2  ;;  %850 = vmatmul.bf16.vlgmr.msra.gmra.mxu0 %v1200_v2 }
 0x283   :  { %v753_v22 = vpop.f32.mrf.mxu1 }
 0x284   :  { %v754_v12 = vadd.f32 %v753_v22, %v402_v41  ;;  %v795_v23 = vpop.f32.mrf.mxu0 }
 0x285   :  { %v796_v24 = vadd.f32 %v795_v23, %v405_v21 }
 0x286   :  { %856 = vst [vmem:[#allocation12] sm:$0xff] %v754_v12 }
 0x287   :  { %859 = vst [vmem:[#allocation12 + $0x18] sm:$0xff] %v796_v24 }
 0x289   :  { %v767_v27 = vpop.f32.mrf.mxu2 }
 0x28a   :  { %v768_v28 = vadd.f32 %v767_v27, %v403_v25  ;;  %v781_v29 = vpop.f32.mrf.mxu3 }
 0x28b   :  { %v782_v30 = vadd.f32 %v781_v29, %v404_v26  ;;  %v755_v31 = vpop.f32.mrf.mxu1 }
 0x28c   :  { %857 = vst [vmem:[#allocation12 + $0x8] sm:$0xff] %v768_v28  ;;  %v756_v32 = vadd.f32 %v755_v31, %v402_v41  ;;  %v797_v33 = vpop.f32.mrf.mxu0 }
 0x28d   :  { %858 = vst [vmem:[#allocation12 + $0x10] sm:$0xff] %v782_v30  ;;  %v798_v34 = vadd.f32 %v797_v33, %v405_v21 }
 0x28e   :  { %864 = vst [vmem:[#allocation12 + $0x40] sm:$0xff] %v756_v32 }
 0x28f   :  { %867 = vst [vmem:[#allocation12 + $0x58] sm:$0xff] %v798_v34 }
 0x291   :  { %v769_v36 = vpop.f32.mrf.mxu2 }
 0x292   :  { %v770_v17 = vadd.f32 %v769_v36, %v403_v25  ;;  %v783_v39 = vpop.f32.mrf.mxu3 }
 0x293   :  { %v784_v40 = vadd.f32 %v783_v39, %v404_v26  ;;  %v809_v42 = vpop.f32.mrf.mxu1 }
 0x294   :  { %865 = vst [vmem:[#allocation12 + $0x48] sm:$0xff] %v770_v17  ;;  %v810_v43 = vadd.f32 %v809_v42, %v406_v35  ;;  %v851_v44 = vpop.f32.mrf.mxu0 }
 0x295   :  { %866 = vst [vmem:[#allocation12 + $0x50] sm:$0xff] %v784_v40  ;;  %v852_v11 = vadd.f32 %v851_v44, %v409_v37 }
 0x296   :  { %860 = vst [vmem:[#allocation12 + $0x20] sm:$0xff] %v810_v43 }
 0x297   :  { %863 = vst [vmem:[#allocation12 + $0x38] sm:$0xff] %v852_v11 }
 0x299   :  { %v823_v47 = vpop.f32.mrf.mxu2 }
 0x29a   :  { %v824_v48 = vadd.f32 %v823_v47, %v407_v45  ;;  %v837_v49 = vpop.f32.mrf.mxu3 }
 0x29b   :  { %v838_v50 = vadd.f32 %v837_v49, %v408_v46  ;;  %v811_v51 = vpop.f32.mrf.mxu1 }
 0x29c   :  { %861 = vst [vmem:[#allocation12 + $0x28] sm:$0xff] %v824_v48  ;;  %v812_v52 = vadd.f32 %v811_v51, %v406_v35  ;;  %v853_v53 = vpop.f32.mrf.mxu0 }
 0x29d   :  { %862 = vst [vmem:[#allocation12 + $0x30] sm:$0xff] %v838_v50  ;;  %v854_v54 = vadd.f32 %v853_v53, %v409_v37 }
 0x29e   :  { %868 = vst [vmem:[#allocation12 + $0x60] sm:$0xff] %v812_v52 }
 0x29f   :  { %871 = vst [vmem:[#allocation12 + $0x78] sm:$0xff] %v854_v54 }
 0x2a1   :  { %v825_v55 = vpop.f32.mrf.mxu2 }
 0x2a2   :  { %v826_v56 = vadd.f32 %v825_v55, %v407_v45  ;;  %v839_v57 = vpop.f32.mrf.mxu3 }
 0x2a3   :  { %v840_v58 = vadd.f32 %v839_v57, %v408_v46 }
 0x2a4   :  { %869 = vst [vmem:[#allocation12 + $0x68] sm:$0xff] %v826_v56 }
 0x2a5   :  { %870 = vst [vmem:[#allocation12 + $0x70] sm:$0xff] %v840_v58 }
 0x2a6   :  { %884 = dma.vmem_to_hbm [thread:$0]  %s877_s4, 2048, %s879_s21, [#allocation5], %s1458_s22, %s1458_s22, %s1448_s26  }
 0x2a7   :  { %1445 = dma.done.wait [#allocation5], 2048  }
 0x2a8   :  { %1446 = vsyncadd [#allocation5], 4294965248 }
 0x2a9   :  { %889 = vsyncpa [#allocation4], 1 }
 0x2aa   :  { %890 = vsyncpa [#allocation7], 1 }
 0x2ab   :  { %891 = vsyncpa [#allocation10], 1 }
 0x2ac   :  { %892 = vsyncpa [#allocation5], 1 }

</bundles_post_ra>
